<compile_context>
chip_gen: v7x
topology: tpu7x:2x2x1
jax: 0.10.0
libtpu: 0.0.40
codegen_flags: <defaults>
</compile_context>

<pallas_src>
import functools

import jax
import jax.numpy as jnp
from jax import lax
from jax.experimental import pallas as pl
from jax.experimental.pallas import tpu as pltpu

_LANE = 128      # lane width (last dim)
_SUBLANE = 8     # sublane width (second-to-last dim)


def _round_up(x, m):
    return (x + m - 1) // m * m


# --------------------------------------------------------------------------
# In-kernel activation (operates on an f32 (tm, d_pad) block; lanes >= d_real
# are padding and must not affect softmax/logsoftmax reductions).
# --------------------------------------------------------------------------
def _apply_activation(y, act, d_real):
    d_pad = y.shape[-1]
    padded = d_pad > d_real
    valid = None
    if padded:
        lane = lax.broadcasted_iota(jnp.int32, y.shape, dimension=1)
        valid = lane < d_real

    if act == "relu":
        y = jnp.maximum(y, 0.0)
    elif act == "tanh":
        y = jnp.tanh(y)
    elif act == "sigmoid":
        y = jax.nn.sigmoid(y)
    elif act == "lrelu":                      # nn.LeakyReLU default slope 0.01
        y = jnp.where(y >= 0.0, y, 0.01 * y)
    elif act == "softmax":                    # nn.Softmax(dim=1)
        if padded:
            y = jnp.where(valid, y, -jnp.inf)
        m = jnp.max(y, axis=1, keepdims=True)
        e = jnp.exp(y - m)
        denom = jnp.sum(e, axis=1, keepdims=True)
        y = e * pl.reciprocal(denom, approx=True)
    elif act == "logsoftmax":                 # nn.LogSoftmax(dim=1)
        if padded:
            y = jnp.where(valid, y, -jnp.inf)
        m = jnp.max(y, axis=1, keepdims=True)
        s = y - m
        y = s - jnp.log(jnp.sum(jnp.exp(s), axis=1, keepdims=True))
    elif act in ("none", None):
        pass
    else:
        raise ValueError(f"unsupported activation: {act}")

    if padded:
        # Keep padded lanes exactly zero so they contribute nothing downstream
        # (and never carry -inf into the next matmul).
        y = jnp.where(valid, y, 0.0)
    return y


# --------------------------------------------------------------------------
# Fused MLP kernel: x tile + all (w_i, b_i) -> final activation tile.
# refs = (x_ref, w0, b0, w1, b1, ..., o_ref)
# --------------------------------------------------------------------------
def _mlp_fused_kernel(*refs, activations, real_out_dims):
    x_ref, o_ref = refs[0], refs[-1]
    h = x_ref[...].astype(jnp.float32)                      # (tm, Din_p)
    for layer in range(len(activations)):
        w = refs[1 + 2 * layer][...]                        # (Din_p, Dout_p) bf16
        b = refs[2 + 2 * layer][...]                        # (1, Dout_p)     f32
        y = jnp.dot(h.astype(jnp.bfloat16), w,
                    preferred_element_type=jnp.float32) + b
        h = _apply_activation(y, activations[layer], real_out_dims[layer])
    o_ref[...] = h.astype(o_ref.dtype)


def mlp_fused_forward(x, weights, biases, activations, real_out_dims):
    """x: (N, Din) f32. weights[i]: (Din_p_i, Dout_p_i) bf16 (zero-padded).
    biases[i]: (1, Dout_p_i) f32 (zero-padded). Returns (N, real_out_dims[-1])."""
    n_layers = len(activations)
    N, din = x.shape
    din_p = weights[0].shape[0]
    dout_p_last = weights[-1].shape[1]

    # Batch tiling: tile rows on a parallel grid axis; weights stay resident.
    block_m = min(256, _round_up(N, _SUBLANE))
    n_pad = _round_up(N, block_m)
    x_p = jnp.pad(x.astype(jnp.float32),
                  ((0, n_pad - N), (0, din_p - din)))

    in_specs = [pl.BlockSpec((block_m, din_p), lambda i: (i, 0))]
    flat_params = []
    for w, b in zip(weights, biases):
        in_specs.append(pl.BlockSpec(w.shape, lambda i: (0, 0)))
        in_specs.append(pl.BlockSpec(b.shape, lambda i: (0, 0)))
        flat_params.extend([w, b])

    kernel = functools.partial(_mlp_fused_kernel,
                               activations=tuple(activations),
                               real_out_dims=tuple(real_out_dims))

    out_p = pl.pallas_call(
        kernel,
        out_shape=jax.ShapeDtypeStruct((n_pad, dout_p_last), jnp.float32),
        grid=(n_pad // block_m,),
        in_specs=in_specs,
        out_specs=pl.BlockSpec((block_m, dout_p_last), lambda i: (i, 0)),
        compiler_params=pltpu.CompilerParams(
            dimension_semantics=("parallel",)),
    )(x_p, *flat_params)

    return out_p[:N, :real_out_dims[-1]]


# --------------------------------------------------------------------------
# MLP wrapper (parameter construction is plain JAX glue)
# --------------------------------------------------------------------------
class MLP:
    """JAX/Pallas re-implementation of the PyTorch MLP module (forward only)."""

    def __init__(self, in_dim, dims, nonlins, key):
        assert len(nonlins) == len(dims)
        self.in_dim = in_dim
        self.out_dim = dims[-1]
        self.nonlins = list(nonlins)
        self.real_out_dims = list(dims)

        self.weights = []   # bf16, lane-padded
        self.biases = []    # f32,  lane-padded
        prev = in_dim
        for output_dim in dims:
            key, wk, bk = jax.random.split(key, 3)
            # PyTorch nn.Linear default init: U(-1/sqrt(fan_in), 1/sqrt(fan_in))
            bound = 1.0 / (prev ** 0.5)
            w = jax.random.uniform(wk, (prev, output_dim), jnp.float32,
                                   -bound, bound)
            b = jax.random.uniform(bk, (1, output_dim), jnp.float32,
                                   -bound, bound)
            din_p = _round_up(prev, _LANE)
            dout_p = _round_up(output_dim, _LANE)
            w_p = jnp.pad(w, ((0, din_p - prev), (0, dout_p - output_dim)))
            b_p = jnp.pad(b, ((0, 0), (0, dout_p - output_dim)))
            self.weights.append(w_p.astype(jnp.bfloat16))
            self.biases.append(b_p)
            prev = output_dim

    def __call__(self, x):
        return mlp_fused_forward(x, self.weights, self.biases,
                                 self.nonlins, self.real_out_dims)


# --------------------------------------------------------------------------
# Reference forward in plain JAX (f32) for a numerical sanity check.
# --------------------------------------------------------------------------
def _reference_forward(x, mlp):
    h = x
    for w, b, act, d in zip(mlp.weights, mlp.biases, mlp.nonlins,
                            mlp.real_out_dims):
        w = w.astype(jnp.float32)[:h.shape[1], :d]
        b = b[:, :d]
        h = h @ w + b
        if act == "relu":
            h = jnp.maximum(h, 0.0)
        elif act == "tanh":
            h = jnp.tanh(h)
        elif act == "sigmoid":
            h = jax.nn.sigmoid(h)
        elif act == "lrelu":
            h = jnp.where(h >= 0.0, h, 0.01 * h)
        elif act == "softmax":
            h = jax.nn.softmax(h, axis=1)
        elif act == "logsoftmax":
            h = jax.nn.log_softmax(h, axis=1)
    return h


# --------------------------------------------------------------------------
if __name__ == "__main__":
    key = jax.random.PRNGKey(0)
    key, xk, pk = jax.random.split(key, 3)

    N, in_dim = 8, 32
    dims = [64, 48, 10]
    nonlins = ["relu", "tanh", "softmax"]

    x = jax.random.normal(xk, (N, in_dim), dtype=jnp.float32)
    mlp = MLP(in_dim, dims, nonlins, pk)

    out = mlp(x)
    out = jax.block_until_ready(out)
    assert out.shape == (N, dims[-1])
    assert bool(jnp.all(jnp.isfinite(out)))

    # Loose tolerance: bf16 matmul operands + approx reciprocal in softmax.
    ref = _reference_forward(x, mlp)
    assert bool(jnp.allclose(out, ref, atol=3e-2, rtol=3e-2))

    print("KERNEL_OK")
</pallas_src>

<mosaic_0001>
module attributes {stable_mosaic.version = 11 : i64} {
  func.func @_mlp_fused_kernel(%arg0: i32, %arg1: memref<8x128xf32, #tpu.memory_space<vmem>>, %arg2: memref<128x128xbf16, #tpu.memory_space<vmem>>, %arg3: memref<1x128xf32, #tpu.memory_space<vmem>>, %arg4: memref<128x128xbf16, #tpu.memory_space<vmem>>, %arg5: memref<1x128xf32, #tpu.memory_space<vmem>>, %arg6: memref<128x128xbf16, #tpu.memory_space<vmem>>, %arg7: memref<1x128xf32, #tpu.memory_space<vmem>>, %arg8: memref<8x128xf32, #tpu.memory_space<vmem>>) attributes {dimension_semantics = [#tpu.dimension_semantics<parallel>], iteration_bounds = array<i64: 1>, scalar_prefetch = 0 : i64, scratch_operands = 0 : i64, tpu.core_type = #tpu.core_type<tc>, window_params = [{transform_indices = @transform_0, window_bounds = array<i64: 8, 128>}, {pipeline_mode = #tpu.pipeline_mode<synchronous>, transform_indices = @transform_1, window_bounds = array<i64: 128, 128>}, {pipeline_mode = #tpu.pipeline_mode<synchronous>, transform_indices = @transform_2, window_bounds = array<i64: 1, 128>}, {pipeline_mode = #tpu.pipeline_mode<synchronous>, transform_indices = @transform_3, window_bounds = array<i64: 128, 128>}, {pipeline_mode = #tpu.pipeline_mode<synchronous>, transform_indices = @transform_4, window_bounds = array<i64: 1, 128>}, {pipeline_mode = #tpu.pipeline_mode<synchronous>, transform_indices = @transform_5, window_bounds = array<i64: 128, 128>}, {pipeline_mode = #tpu.pipeline_mode<synchronous>, transform_indices = @transform_6, window_bounds = array<i64: 1, 128>}, {transform_indices = @transform_7, window_bounds = array<i64: 8, 128>}]} {
    %c0 = arith.constant 0 : index
    %c0_0 = arith.constant 0 : index
    %0 = vector.load %arg1[%c0, %c0_0] : memref<8x128xf32, #tpu.memory_space<vmem>>, vector<8x128xf32>
    %c0_1 = arith.constant 0 : index
    %c0_2 = arith.constant 0 : index
    %1 = vector.load %arg2[%c0_1, %c0_2] : memref<128x128xbf16, #tpu.memory_space<vmem>>, vector<128x128xbf16>
    %c0_3 = arith.constant 0 : index
    %c0_4 = arith.constant 0 : index
    %2 = vector.load %arg3[%c0_3, %c0_4] : memref<1x128xf32, #tpu.memory_space<vmem>>, vector<1x128xf32>
    %3 = arith.truncf %0 : vector<8x128xf32> to vector<8x128xbf16>
    %cst = arith.constant dense<0.000000e+00> : vector<8x128xf32>
    %4 = tpu.matmul %3, %1, %cst {dimension_numbers = #tpu.dot_dimension_numbers<[1], [0], [0], [1], [0, 0, 1, 1], [], []>} : vector<8x128xbf16>, vector<128x128xbf16>, vector<8x128xf32> -> vector<8x128xf32>
    %5 = vector.broadcast %2 : vector<1x128xf32> to vector<8x128xf32>
    %6 = arith.addf %4, %5 : vector<8x128xf32>
    %7 = tpu.iota {dimensions = array<i32: 1>} : vector<8x128xi32>
    %c64_i32 = arith.constant 64 : i32
    %8 = vector.broadcast %c64_i32 : i32 to vector<8x128xi32>
    %9 = arith.cmpi slt, %7, %8 : vector<8x128xi32>
    %cst_5 = arith.constant 0.000000e+00 : f32
    %10 = vector.broadcast %cst_5 : f32 to vector<8x128xf32>
    %11 = arith.maximumf %6, %10 : vector<8x128xf32>
    %cst_6 = arith.constant 0.000000e+00 : f32
    %12 = vector.broadcast %cst_6 : f32 to vector<8x128xf32>
    %13 = arith.select %9, %11, %12 : vector<8x128xi1>, vector<8x128xf32>
    %c0_7 = arith.constant 0 : index
    %c0_8 = arith.constant 0 : index
    %14 = vector.load %arg4[%c0_7, %c0_8] : memref<128x128xbf16, #tpu.memory_space<vmem>>, vector<128x128xbf16>
    %c0_9 = arith.constant 0 : index
    %c0_10 = arith.constant 0 : index
    %15 = vector.load %arg5[%c0_9, %c0_10] : memref<1x128xf32, #tpu.memory_space<vmem>>, vector<1x128xf32>
    %16 = arith.truncf %13 : vector<8x128xf32> to vector<8x128xbf16>
    %cst_11 = arith.constant dense<0.000000e+00> : vector<8x128xf32>
    %17 = tpu.matmul %16, %14, %cst_11 {dimension_numbers = #tpu.dot_dimension_numbers<[1], [0], [0], [1], [0, 0, 1, 1], [], []>} : vector<8x128xbf16>, vector<128x128xbf16>, vector<8x128xf32> -> vector<8x128xf32>
    %18 = vector.broadcast %15 : vector<1x128xf32> to vector<8x128xf32>
    %19 = arith.addf %17, %18 : vector<8x128xf32>
    %20 = tpu.iota {dimensions = array<i32: 1>} : vector<8x128xi32>
    %c48_i32 = arith.constant 48 : i32
    %21 = vector.broadcast %c48_i32 : i32 to vector<8x128xi32>
    %22 = arith.cmpi slt, %20, %21 : vector<8x128xi32>
    %23 = math.tanh %19 : vector<8x128xf32>
    %cst_12 = arith.constant 0.000000e+00 : f32
    %24 = vector.broadcast %cst_12 : f32 to vector<8x128xf32>
    %25 = arith.select %22, %23, %24 : vector<8x128xi1>, vector<8x128xf32>
    %c0_13 = arith.constant 0 : index
    %c0_14 = arith.constant 0 : index
    %26 = vector.load %arg6[%c0_13, %c0_14] : memref<128x128xbf16, #tpu.memory_space<vmem>>, vector<128x128xbf16>
    %c0_15 = arith.constant 0 : index
    %c0_16 = arith.constant 0 : index
    %27 = vector.load %arg7[%c0_15, %c0_16] : memref<1x128xf32, #tpu.memory_space<vmem>>, vector<1x128xf32>
    %28 = arith.truncf %25 : vector<8x128xf32> to vector<8x128xbf16>
    %cst_17 = arith.constant dense<0.000000e+00> : vector<8x128xf32>
    %29 = tpu.matmul %28, %26, %cst_17 {dimension_numbers = #tpu.dot_dimension_numbers<[1], [0], [0], [1], [0, 0, 1, 1], [], []>} : vector<8x128xbf16>, vector<128x128xbf16>, vector<8x128xf32> -> vector<8x128xf32>
    %30 = vector.broadcast %27 : vector<1x128xf32> to vector<8x128xf32>
    %31 = arith.addf %29, %30 : vector<8x128xf32>
    %32 = tpu.iota {dimensions = array<i32: 1>} : vector<8x128xi32>
    %c10_i32 = arith.constant 10 : i32
    %33 = vector.broadcast %c10_i32 : i32 to vector<8x128xi32>
    %34 = arith.cmpi slt, %32, %33 : vector<8x128xi32>
    %cst_18 = arith.constant 0xFF800000 : f32
    %35 = vector.broadcast %cst_18 : f32 to vector<8x128xf32>
    %36 = arith.select %34, %31, %35 : vector<8x128xi1>, vector<8x128xf32>
    %cst_19 = arith.constant dense<0xFF800000> : vector<8xf32>
    %37 = vector.multi_reduction <maximumf>, %36, %cst_19 [1] : vector<8x128xf32> to vector<8xf32>
    %38 = vector.shape_cast %37 : vector<8xf32> to vector<8x1xf32>
    %39 = vector.broadcast %38 : vector<8x1xf32> to vector<8x128xf32>
    %40 = arith.subf %36, %39 : vector<8x128xf32>
    %41 = math.exp %40 : vector<8x128xf32>
    %cst_20 = arith.constant dense<0.000000e+00> : vector<8xf32>
    %42 = vector.multi_reduction <add>, %41, %cst_20 [1] : vector<8x128xf32> to vector<8xf32>
    %43 = vector.shape_cast %42 : vector<8xf32> to vector<8x1xf32>
    %44 = tpu.reciprocal %43 {approx = true} : vector<8x1xf32> -> vector<8x1xf32>
    %45 = vector.broadcast %44 : vector<8x1xf32> to vector<8x128xf32>
    %46 = arith.mulf %41, %45 : vector<8x128xf32>
    %cst_21 = arith.constant 0.000000e+00 : f32
    %47 = vector.broadcast %cst_21 : f32 to vector<8x128xf32>
    %48 = arith.select %34, %46, %47 : vector<8x128xi1>, vector<8x128xf32>
    %c0_22 = arith.constant 0 : index
    %c0_23 = arith.constant 0 : index
    %49 = vector.load %arg8[%c0_22, %c0_23] : memref<8x128xf32, #tpu.memory_space<vmem>>, vector<8x128xf32>
    tpu.vector_store %arg8[%c0_22, %c0_23], %48 {strides = array<i32>} : memref<8x128xf32, #tpu.memory_space<vmem>>, vector<8x128xf32>,
    return
  }
  func.func @transform_0(%arg0: i32) -> (i32, i32) {
    %c0_i32 = arith.constant 0 : i32
    %c0_i32_0 = arith.constant 0 : i32
    return %arg0, %c0_i32 : i32, i32
  }
  func.func @transform_1(%arg0: i32) -> (i32, i32) {
    %c0_i32 = arith.constant 0 : i32
    %c0_i32_0 = arith.constant 0 : i32
    %c0_i32_1 = arith.constant 0 : i32
    return %c0_i32, %c0_i32_0 : i32, i32
  }
  func.func @transform_2(%arg0: i32) -> (i32, i32) {
    %c0_i32 = arith.constant 0 : i32
    %c0_i32_0 = arith.constant 0 : i32
    %c0_i32_1 = arith.constant 0 : i32
    return %c0_i32, %c0_i32_0 : i32, i32
  }
  func.func @transform_3(%arg0: i32) -> (i32, i32) {
    %c0_i32 = arith.constant 0 : i32
    %c0_i32_0 = arith.constant 0 : i32
    %c0_i32_1 = arith.constant 0 : i32
    return %c0_i32, %c0_i32_0 : i32, i32
  }
  func.func @transform_4(%arg0: i32) -> (i32, i32) {
    %c0_i32 = arith.constant 0 : i32
    %c0_i32_0 = arith.constant 0 : i32
    %c0_i32_1 = arith.constant 0 : i32
    return %c0_i32, %c0_i32_0 : i32, i32
  }
  func.func @transform_5(%arg0: i32) -> (i32, i32) {
    %c0_i32 = arith.constant 0 : i32
    %c0_i32_0 = arith.constant 0 : i32
    %c0_i32_1 = arith.constant 0 : i32
    return %c0_i32, %c0_i32_0 : i32, i32
  }
  func.func @transform_6(%arg0: i32) -> (i32, i32) {
    %c0_i32 = arith.constant 0 : i32
    %c0_i32_0 = arith.constant 0 : i32
    %c0_i32_1 = arith.constant 0 : i32
    return %c0_i32, %c0_i32_0 : i32, i32
  }
  func.func @transform_7(%arg0: i32) -> (i32, i32) {
    %c0_i32 = arith.constant 0 : i32
    %c0_i32_0 = arith.constant 0 : i32
    return %arg0, %c0_i32 : i32, i32
  }
}

</mosaic_0001>

<bundles_post_ra>
// kernel: tpu_custom_call.1
= control target key start
LH: loop header
LB: loop body
LE: loop exit
PB: predicated region body
PF: predicated region fallthrough
CT: control target
= control target key end

     0   :  { %12 = vsyncpa [#allocation3], 0  ;;  %s892_s0 = inlined_call_operand.hbm [shape: f32[8,128], index: 0, kind: input, shape index: {}]   ;;  %s893_s1 = inlined_call_operand.hbm [shape: bf16[128,128], index: 1, kind: input, shape index: {}]   ;;  %s894_s2 = inlined_call_operand.vmem [shape: f32[1,128], index: 2, kind: input, shape index: {}]   ;;  %s895_s3 = inlined_call_operand.hbm [shape: bf16[128,128], index: 3, kind: input, shape index: {}]   ;;  %s896_s4 = inlined_call_operand.vmem [shape: f32[1,128], index: 4, kind: input, shape index: {}]   ;;  %s897_s5 = inlined_call_operand.hbm [shape: bf16[128,128], index: 5, kind: input, shape index: {}]   ;;  %s898_s6 = inlined_call_operand.vmem [shape: f32[1,128], index: 6, kind: input, shape index: {}]   ;;  %s899_s7 = inlined_call_operand.hbm [shape: f32[8,128], index: 7, kind: output, shape index: {}]  }
   0x1   :  { %13 = vsyncpa [#allocation6], 0 }
   0x2   :  { %14 = vsyncpa [#allocation9], 0 }
   0x3   :  { %15 = vsyncpa [#allocation4], 0  ;;  %s733_s24 = smov [#allocation5]   ;;  %s615_s28 = scalar_lea.hbm %s893_s1, 1024 }
   0x4   :  { %s31_s25 = sshll.u32 %s733_s24, 4  ;;  %p616_p0 = scmp.ne.s32.totalorder %s893_s1, %s615_s28  ;;  %s32_s25 = int_to_ptr.vmem [resolvable:$true] %s31_s25 }
   0x5   :  { %p619_p1 = scmp.lt.u32.totalorder %s615_s28, %s893_s1 }
   0x7   :  { %p621_p2 = pnand %p619_p1, %p616_p0 }
   0x9   :  { %624 = shalt.err (!%p621_p2)
}
   0xa   :  { %s625_s10 = scalar_lea.vmem %s32_s25, 1024  ;;  %p630_p4 = scmp.lt.s32.totalorder %s32_s25, %s32_s25 }
   0xb   :  { %p626_p3 = scmp.ne.s32.totalorder %s32_s25, %s625_s10  ;;  %p631_p5 = scmp.lt.s32.totalorder %s625_s10, %s625_s10 }
   0xd   :  { %p632_p6 = por %p631_p5, %p630_p4 }
   0xf   :  { %p633_p7 = pnand %p632_p6, %p626_p3 }
  0x11   :  { %636 = shalt.err (!%p633_p7)
}
  0x12   :  { %s734_s11 = smov 64   ;;  %s735_s12 = smov 4  }
  0x13   :  { %37 = dma.hbm_to_vmem [thread:$0]  %s893_s1, 1024, %s32_s25, [#allocation6], %s734_s11, %s734_s11, %s735_s12  }
  0x14   :  { %s736_s15 = smov [#allocation2]   ;;  %s737_s17 = smov [#allocation7]  }
  0x15   :  { %s22_s16 = sshll.u32 %s736_s15, 4  ;;  %s45_s18 = sshll.u32 %s737_s17, 4  ;;  %s23_s16 = int_to_ptr.vmem [resolvable:$true] %s22_s16  ;;  %s46_s18 = int_to_ptr.vmem [resolvable:$true] %s45_s18 }
  0x16   :  { %s637_s21 = scalar_lea.hbm %s892_s0, 128 }
  0x17   :  { %p638_p8 = scmp.ne.s32.totalorder %s892_s0, %s637_s21  ;;  %p641_p9 = scmp.lt.u32.totalorder %s637_s21, %s892_s0 }
  0x19   :  { %p643_p10 = pnand %p641_p9, %p638_p8 }
  0x1b   :  { %646 = shalt.err (!%p643_p10)
}
  0x1c   :  { %s647_s1 = scalar_lea.vmem %s23_s16, 128  ;;  %p652_p12 = scmp.lt.s32.totalorder %s23_s16, %s23_s16 }
  0x1d   :  { %p648_p11 = scmp.ne.s32.totalorder %s23_s16, %s647_s1  ;;  %p653_p13 = scmp.lt.s32.totalorder %s647_s1, %s647_s1 }
  0x1f   :  { %p654_p0 = por %p653_p13, %p652_p12 }
  0x21   :  { %p655_p1 = pnand %p654_p0, %p648_p11 }
  0x23   :  { %658 = shalt.err (!%p655_p1)
}
  0x24   :  { %25 = dma.hbm_to_vmem [thread:$0]  %s892_s0, 128, %s23_s16, [#allocation3]  }
  0x25   :  { %s659_s30 = scalar_lea.hbm %s895_s3, 1024 }
  0x26   :  { %p660_p2 = scmp.ne.s32.totalorder %s895_s3, %s659_s30  ;;  %p663_p3 = scmp.lt.u32.totalorder %s659_s30, %s895_s3 }
  0x28   :  { %p665_p4 = pnand %p663_p3, %p660_p2 }
  0x2a   :  { %668 = shalt.err (!%p665_p4)
}
  0x2b   :  { %s669_s14 = scalar_lea.vmem %s46_s18, 1024  ;;  %p674_p6 = scmp.lt.s32.totalorder %s46_s18, %s46_s18 }
  0x2c   :  { %p670_p5 = scmp.ne.s32.totalorder %s46_s18, %s669_s14  ;;  %p675_p7 = scmp.lt.s32.totalorder %s669_s14, %s669_s14 }
  0x2e   :  { %p676_p8 = por %p675_p7, %p674_p6 }
  0x30   :  { %p677_p9 = pnand %p676_p8, %p670_p5 }
  0x32   :  { %680 = shalt.err (!%p677_p9)
}
  0x33   :  { %51 = dma.hbm_to_vmem [thread:$0]  %s895_s3, 1024, %s46_s18, [#allocation6], %s734_s11, %s734_s11, %s735_s12  }
  0x34   :  { %s738_s16 = smov [#allocation8]   ;;  %s681_s21 = scalar_lea.hbm %s897_s5, 1024 }
  0x35   :  { %s59_s17 = sshll.u32 %s738_s16, 4  ;;  %p682_p10 = scmp.ne.s32.totalorder %s897_s5, %s681_s21  ;;  %s60_s17 = int_to_ptr.vmem [resolvable:$true] %s59_s17 }
  0x36   :  { %p685_p11 = scmp.lt.u32.totalorder %s681_s21, %s897_s5 }
  0x38   :  { %p687_p12 = pnand %p685_p11, %p682_p10 }
  0x3a   :  { %690 = shalt.err (!%p687_p12)
}
  0x3b   :  { %s691_s1 = scalar_lea.vmem %s60_s17, 1024  ;;  %p696_p0 = scmp.lt.s32.totalorder %s60_s17, %s60_s17 }
  0x3c   :  { %p692_p13 = scmp.ne.s32.totalorder %s60_s17, %s691_s1  ;;  %p697_p1 = scmp.lt.s32.totalorder %s691_s1, %s691_s1 }
  0x3e   :  { %p698_p2 = por %p697_p1, %p696_p0 }
  0x40   :  { %p699_p3 = pnand %p698_p2, %p692_p13 }
  0x42   :  { %702 = shalt.err (!%p699_p3)
}
  0x43   :  { %65 = dma.hbm_to_vmem [thread:$0]  %s897_s5, 1024, %s60_s17, [#allocation9], %s734_s11, %s734_s11, %s735_s12  }
  0x44   :  { %725 = dma.done.wait [#allocation3], 128  }
  0x45   :  { %726 = vsyncadd [#allocation3], 4294967168 }
  0x46   :  { %727 = dma.done.wait [#allocation6], 2048  }
  0x47   :  { %728 = vsyncadd [#allocation6], 4294965248 }
  0x48   :  { %729 = dma.done.wait [#allocation9], 1024  }
  0x49   :  { %730 = vsyncadd [#allocation9], 4294966272  ;;  %v739_v0 = vmov 0.0   ;;  %vm740_vm0 = vmmov 0   ;;  %v585_v1 = vld [vmem:[#allocation5] sm:$0xff]   ;;  %v586_v2 = vld [vmem:[#allocation5 + $0x8] sm:$0xff]   ;;  %v194_v23 = vlaneseq }
  0x4a   :  { %516 = vmatprep.subr.bf16.mxu0 %v739_v0  ;;  %532 = vmatprep.mubr.msk.bf16.mxu0 %vm740_vm0, %v739_v0  ;;  %v587_v3 = vld [vmem:[#allocation5 + $0x10] sm:$0xff]   ;;  %v593_v4 = vld [vmem:[#allocation7] sm:$0xff]   ;;  %v588_v5 = vld [vmem:[#allocation5 + $0x18] sm:$0xff]  }
  0x4b   :  { %536 = vmatprep.subr.bf16.mxu1 %v739_v0  ;;  %552 = vmatprep.mubr.msk.bf16.mxu1 %vm740_vm0, %v739_v0  ;;  %v594_v6 = vld [vmem:[#allocation7 + $0x8] sm:$0xff]   ;;  %v589_v7 = vld [vmem:[#allocation5 + $0x20] sm:$0xff]   ;;  %v595_v8 = vld [vmem:[#allocation7 + $0x10] sm:$0xff]   ;;  %v195_v24 = vand.u32 127, %v194_v23 }
  0x4c   :  { %517 = vmatpush3.bf16.msra.mxu0 %v585_v1  ;;  %537 = vmatpush3.bf16.msra.mxu1 %v593_v4  ;;  %v590_v9 = vld [vmem:[#allocation5 + $0x28] sm:$0xff]   ;;  %v596_v10 = vld [vmem:[#allocation7 + $0x18] sm:$0xff]   ;;  %v591_v11 = vld [vmem:[#allocation5 + $0x30] sm:$0xff]  }
  0x4d   :  { %518 = vmatprep.subr.bf16.mxu0 %v739_v0  ;;  %538 = vmatprep.subr.bf16.mxu1 %v739_v0  ;;  %v597_v12 = vld [vmem:[#allocation7 + $0x20] sm:$0xff]   ;;  %v592_v13 = vld [vmem:[#allocation5 + $0x38] sm:$0xff]   ;;  %v598_v15 = vld [vmem:[#allocation7 + $0x28] sm:$0xff]   ;;  %vm196_vm1 = vcmp.lt.s32.totalorder %v195_v24, 64  ;;  %vm311_vm3 = vcmp.lt.s32.totalorder %v195_v24, 48  ;;  %vm426_vm5 = vcmp.lt.s32.totalorder %v195_v24, 10 }
  0x4e   :  { %v81_v14 = vld [vmem:[#allocation2] sm:$0xff]  ;;  %v599_v17 = vld [vmem:[#allocation7 + $0x30] sm:$0xff]   ;;  %v601_v19 = vld [vmem:[#allocation8] sm:$0xff]  }
  0x4f   :  { %v99_v16 = vpack.c.bf16 %v81_v14, %v81_v14  ;;  %v600_v18 = vld [vmem:[#allocation7 + $0x38] sm:$0xff]   ;;  %v602_v20 = vld [vmem:[#allocation8 + $0x8] sm:$0xff]   ;;  %v603_v21 = vld [vmem:[#allocation8 + $0x10] sm:$0xff]  }
  0x50   :  { %519 = vmatpush3.bf16.msra.mxu0 %v586_v2  ;;  %539 = vmatpush3.bf16.msra.mxu1 %v594_v6  ;;  %v604_v22 = vld [vmem:[#allocation8 + $0x18] sm:$0xff]   ;;  %vm474_vm2 = vmpackc.low %vm196_vm1, %vm196_vm1  ;;  %v605_v33 = vld [vmem:[#allocation8 + $0x20] sm:$0xff]  }
  0x51   :  { %520 = vmatprep.subr.bf16.mxu0 %v739_v0  ;;  %540 = vmatprep.subr.bf16.mxu1 %v739_v0  ;;  %v456_v25 = vld [vmem:[%s894_s2] ss:$0 sm:$0xff]  ;;  %v606_v34 = vld [vmem:[#allocation8 + $0x28] sm:$0xff]   ;;  %v607_v35 = vld [vmem:[#allocation8 + $0x30] sm:$0xff]  }
  0x52   :  { %v608_v36 = vld [vmem:[#allocation8 + $0x38] sm:$0xff]   ;;  %vm486_vm4 = vmpackc.low %vm311_vm3, %vm311_vm3 }
  0x53   :  { %v465_v37 = vld [vmem:[%s896_s4] ss:$0 sm:$0xff]  ;;  %s741_s4 = smov [#allocation10]  }
  0x54   :  { %521 = vmatpush3.bf16.msra.mxu0 %v587_v3  ;;  %541 = vmatpush3.bf16.msra.mxu1 %v595_v8  ;;  %v477_v45 = vld [vmem:[%s898_s6] ss:$0 sm:$0xff]  ;;  %s445_s28 = sshll.u32 %s741_s4, 4  ;;  %s446_s28 = int_to_ptr.vmem [resolvable:$true] %s445_s28 }
  0x55   :  { %522 = vmatprep.subr.bf16.mxu0 %v739_v0  ;;  %542 = vmatprep.subr.bf16.mxu1 %v739_v0  ;;  %s703_s6 = scalar_lea.vmem %s446_s28, 128  ;;  %p708_p5 = scmp.lt.s32.totalorder %s446_s28, %s446_s28 }
  0x56   :  { %p704_p4 = scmp.ne.s32.totalorder %s446_s28, %s703_s6  ;;  %p709_p6 = scmp.lt.s32.totalorder %s703_s6, %s703_s6 }
  0x58   :  { %523 = vmatpush3.bf16.msra.mxu0 %v588_v5  ;;  %543 = vmatpush3.bf16.msra.mxu1 %v596_v10  ;;  %p710_p7 = por %p709_p6, %p708_p5 }
  0x59   :  { %524 = vmatprep.subr.bf16.mxu0 %v739_v0  ;;  %544 = vmatprep.subr.bf16.mxu1 %v739_v0 }
  0x5a   :  { %p711_p8 = pnand %p710_p7, %p704_p4 }
  0x5c   :  { %525 = vmatpush3.bf16.msra.mxu0 %v589_v7  ;;  %545 = vmatpush3.bf16.msra.mxu1 %v597_v12 }
  0x5d   :  { %526 = vmatprep.subr.bf16.mxu0 %v739_v0  ;;  %546 = vmatprep.subr.bf16.mxu1 %v739_v0 }
  0x60   :  { %527 = vmatpush3.bf16.msra.mxu0 %v590_v9  ;;  %547 = vmatpush3.bf16.msra.mxu1 %v598_v15 }
  0x61   :  { %528 = vmatprep.subr.bf16.mxu0 %v739_v0  ;;  %548 = vmatprep.subr.bf16.mxu1 %v739_v0 }
  0x64   :  { %529 = vmatpush3.bf16.msra.mxu0 %v591_v11  ;;  %549 = vmatpush3.bf16.msra.mxu1 %v599_v17 }
  0x65   :  { %530 = vmatprep.subr.bf16.mxu0 %v739_v0  ;;  %550 = vmatprep.subr.bf16.mxu1 %v739_v0 }
  0x68   :  { %531 = vmatpush3.bf16.msra.mxu0 %v592_v13  ;;  %551 = vmatpush3.bf16.msra.mxu1 %v600_v18 }
  0x69   :  { %556 = vmatprep.subr.bf16.mxu0 %v739_v0 }
  0x6b   :  { %533 = vmatmul.mubr.bf16.vlgmr.msra.gmra.mrb[0].mxu0 %v99_v16 }
  0x6c   :  { %572 = vmatprep.mubr.msk.bf16.mxu0 %vm740_vm0, %v739_v0  ;;  %557 = vmatpush3.bf16.msra.mxu0 %v601_v19 }
  0x6d   :  { %558 = vmatprep.subr.bf16.mxu0 %v739_v0 }
  0x70   :  { %559 = vmatpush3.bf16.msra.mxu0 %v602_v20 }
  0x71   :  { %560 = vmatprep.subr.bf16.mxu0 %v739_v0 }
  0x74   :  { %561 = vmatpush3.bf16.msra.mxu0 %v603_v21 }
  0x75   :  { %562 = vmatprep.subr.bf16.mxu0 %v739_v0 }
  0x78   :  { %563 = vmatpush3.bf16.msra.mxu0 %v604_v22 }
  0x79   :  { %564 = vmatprep.subr.bf16.mxu0 %v739_v0 }
  0x7c   :  { %565 = vmatpush3.bf16.msra.mxu0 %v605_v33 }
  0x7d   :  { %566 = vmatprep.subr.bf16.mxu0 %v739_v0 }
  0x80   :  { %567 = vmatpush3.bf16.msra.mxu0 %v606_v34 }
  0x81   :  { %568 = vmatprep.subr.bf16.mxu0 %v739_v0 }
  0x84   :  { %569 = vmatpush3.bf16.msra.mxu0 %v607_v35 }
  0x85   :  { %570 = vmatprep.subr.bf16.mxu0 %v739_v0 }
  0x88   :  { %571 = vmatpush3.bf16.msra.mxu0 %v608_v36 }
 0x13e   :  { %v188_v26 = vpop.f32.mrb[0].mxu0 }
 0x13f   :  { %v189_v27 = vadd.f32 %v456_v25, %v188_v26  ;;  %v534_v28 = vpop.f32.mrb[1].mxu0 }
 0x140   :  { %v191_v29 = vpop.f32.mrb[2].mxu0 }
 0x141   :  { %v197_v30 = vmax.f32 %v189_v27, 0.0  ;;  %v535_v31 = vpop.f32.mrb[3].mxu0 }
 0x143   :  { %v475_v32 = vpack.c.bf16 %v197_v30, %v197_v30 }
 0x145   :  { %553 = vmatmul.mubr.msk.bf16.vlgmr.msra.gmra.mrb[0].mxu1 %vm474_vm2, %v475_v32 }
 0x218   :  { %v305_v38 = vpop.f32.mrb[0].mxu1 }
 0x219   :  { %v306_v39 = vadd.f32 %v465_v37, %v305_v38  ;;  %v554_v40 = vpop.f32.mrb[1].mxu1 }
 0x21a   :  { %v308_v41 = vpop.f32.mrb[2].mxu1 }
 0x21b   :  { %609 = vtanh.f32 %v306_v39  ;;  %v555_v42 = vpop.f32.mrb[3].mxu1 }
 0x225   :  { %v610_v43 = vpop.eup %609 }
 0x226   :  { %v487_v44 = vpack.c.bf16 %v610_v43, %v610_v43 }
 0x228   :  { %573 = vmatmul.mubr.msk.bf16.vlgmr.msra.gmra.mrb[4].mxu0 %vm486_vm4, %v487_v44 }
 0x2fb   :  { %v420_v46 = vpop.f32.mrb[4].mxu0 }
 0x2fc   :  { %v421_v47 = vadd.f32 %v477_v45, %v420_v46  ;;  %v574_v48 = vpop.f32.mrb[5].mxu0 }
 0x2fd   :  { %v423_v49 = vpop.f32.mrb[6].mxu0 }
 0x2fe   :  { %v575_v50 = vpop.f32.mrb[7].mxu0  ;;  %v427_v51 = vsel %vm426_vm5, %v421_v47, -inf }
 0x2ff   :  { %428 = vmax.xlane.f32.xlu0 %v427_v51 }
 0x38c   :  { %v429_v52 = vpop.xlane.xlu0 %428 }
 0x38d   :  { %v430_v53 = vsub.f32 %v427_v51, %v429_v52 }
 0x38f   :  { %v431_v54 = vmul.f32 1.442695, %v430_v53 }
 0x391   :  { %611 = vpow2.f32 %v431_v54 }
 0x39b   :  { %v612_v55 = vpop.eup %611 }
 0x39c   :  { %433 = vadd.xlane.f32.xlu0 %v612_v55 }
 0x429   :  { %v434_v56 = vpop.xlane.xlu0 %433 }
 0x42a   :  { %613 = vrcp.f32 %v434_v56 }
 0x434   :  { %v614_v57 = vpop.eup %613 }
 0x435   :  { %v436_v58 = vmul.f32 %v614_v57, %v612_v55 }
 0x437   :  { %v437_v59 = vsel %vm426_vm5, %v436_v58, 0.0 }
 0x438   :  { %438 = vst [vmem:[#allocation10] sm:$0xff] %v437_v59 }
 0x439   :  { %714 = shalt.err (!%p711_p8)
}
 0x43a   :  { %s715_s8 = scalar_lea.hbm %s899_s7, 128 }
 0x43b   :  { %p716_p9 = scmp.ne.s32.totalorder %s899_s7, %s715_s8  ;;  %p719_p10 = scmp.lt.u32.totalorder %s715_s8, %s899_s7 }
 0x43d   :  { %p721_p11 = pnand %p719_p10, %p716_p9 }
 0x43f   :  { %724 = shalt.err (!%p721_p11)
}
 0x440   :  { %448 = dma.vmem_to_hbm [thread:$0]  %s446_s28, 128, %s899_s7, [#allocation4]  }
 0x441   :  { %731 = dma.done.wait [#allocation4], 128  }
 0x442   :  { %732 = vsyncadd [#allocation4], 4294967168 }
 0x443   :  { %452 = vsyncpa [#allocation3], 1 }
 0x444   :  { %453 = vsyncpa [#allocation6], 1 }
 0x445   :  { %454 = vsyncpa [#allocation9], 1 }
 0x446   :  { %455 = vsyncpa [#allocation4], 1 }

</bundles_post_ra>
